<compile_context>
chip_gen: v5e
topology: v5e:2x2
jax: 0.10.0
libtpu: 0.0.40
codegen_flags: <defaults>
</compile_context>

<pallas_src>
import jax
import jax.numpy as jnp
from jax.experimental import pallas as pl
from jax.experimental.pallas import tpu as pltpu


def _neuron_kernel(w_ref, b_ref, xt_ref, ot_ref):
    """One batch tile.

    w_ref : SMEM (T, D)  -- PyTorch Linear weight layout, read as scalars.
    b_ref : SMEM (T,)    -- bias, read as scalars.
    xt_ref: VMEM (D, TB) -- x transposed: batch on the lane (fast) axis.
    ot_ref: VMEM (T, TB) -- sigmoid(W x + b), transposed (lane-dense stores).
    """
    T, D = w_ref.shape
    xt = xt_ref[...]                              # (D, TB): one small VMEM slab
    for t in range(T):                            # static unroll: T*D = 15 VPU FMAs
        acc = xt[0:1, :] * w_ref[t, 0] + b_ref[t]
        for d in range(1, D):
            acc = acc + xt[d:d + 1, :] * w_ref[t, d]
        # relu(sigmoid(z)) == sigmoid(z): sigmoid range is [0, 1) -> ReLU dropped.
        ot_ref[t:t + 1, :] = jax.nn.sigmoid(acc)


def neuron_forward(x, weight, bias, *, block_b=512):
    """y = relu(sigmoid(x @ weight.T + bias)).

    x: (B, D) f32, weight: (T, D) f32 (PyTorch Linear layout), bias: (T,) f32.
    Returns (B, T) f32.
    """
    B, D = x.shape
    T, D2 = weight.shape
    assert D == D2 and bias.shape == (T,)
    assert block_b % 128 == 0

    # Small batches run as a single full-extent block (block == full array dim,
    # so the (8,128) divisibility rule is satisfied); large batches are padded
    # to a multiple of block_b and streamed over the grid.
    if B <= block_b:
        tb, b_pad = B, B
    else:
        tb = block_b
        b_pad = ((B + tb - 1) // tb) * tb

    # Wrapper-side layout plumbing (negligible vs. the kernel): batch -> lanes.
    xt = x.T                                             # (D, B)
    if b_pad != B:
        xt = jnp.pad(xt, ((0, 0), (0, b_pad - B)))       # (D, b_pad)

    out_t = pl.pallas_call(
        _neuron_kernel,
        out_shape=jax.ShapeDtypeStruct((T, b_pad), x.dtype),
        grid=(b_pad // tb,),
        in_specs=[
            # 15 weights + 3 biases: SMEM scalar tables (no VMEM DMA, no vreg pad).
            pl.BlockSpec(memory_space=pltpu.MemorySpace.SMEM),
            pl.BlockSpec(memory_space=pltpu.MemorySpace.SMEM),
            pl.BlockSpec((D, tb), lambda i: (0, i)),
        ],
        out_specs=pl.BlockSpec((T, tb), lambda i: (0, i)),
        compiler_params=pltpu.CompilerParams(
            # Batch tiles are independent -> shard the grid across v7x's 2 TCs.
            dimension_semantics=("parallel",),
        ),
    )(weight, bias, xt)

    return out_t[:, :B].T                                # back to (B, T)


if __name__ == "__main__":
    n_dims, n_targets, batch = 5, 3, 200

    key = jax.random.PRNGKey(0)
    kx, kw, kb = jax.random.split(key, 3)

    # Deterministic PyTorch-like uniform(-1/sqrt(fan_in), 1/sqrt(fan_in)) init.
    bound = 1.0 / (n_dims ** 0.5)
    weight = jax.random.uniform(kw, (n_targets, n_dims), jnp.float32, -bound, bound)
    bias = jax.random.uniform(kb, (n_targets,), jnp.float32, -bound, bound)
    x = jax.random.normal(kx, (batch, n_dims), jnp.float32)

    ref = jnp.maximum(jax.nn.sigmoid(x @ weight.T + bias), 0.0)

    # Tiled path: B=200 > 128 -> 2 grid steps + ragged-tail padding.
    y = neuron_forward(x, weight, bias, block_b=128)
    jax.block_until_ready(y)
    assert y.shape == (batch, n_targets)
    assert jnp.allclose(y, ref, atol=1e-5, rtol=1e-5), "mismatch vs reference (tiled)"

    # Single-block path (small batch, block == full array extents).
    y_small = neuron_forward(x[:8], weight, bias)
    jax.block_until_ready(y_small)
    assert jnp.allclose(y_small, ref[:8], atol=1e-5, rtol=1e-5), "mismatch vs reference (small)"

    print("KERNEL_OK")
</pallas_src>

<mosaic_0001>
module attributes {stable_mosaic.version = 11 : i64} {
  func.func @_neuron_kernel(%arg0: i32, %arg1: memref<3x5xf32, #tpu.memory_space<smem>>, %arg2: memref<3xf32, #tpu.memory_space<smem>>, %arg3: memref<5x128xf32, #tpu.memory_space<vmem>>, %arg4: memref<3x128xf32, #tpu.memory_space<vmem>>) attributes {dimension_semantics = [#tpu.dimension_semantics<parallel>], iteration_bounds = array<i64: 2>, scalar_prefetch = 0 : i64, scratch_operands = 0 : i64, tpu.core_type = #tpu.core_type<tc>, window_params = [{transform_indices = @transform_0, window_bounds = array<i64: 3, 5>}, {transform_indices = @transform_1, window_bounds = array<i64: 3>}, {transform_indices = @transform_2, window_bounds = array<i64: 5, 128>}, {transform_indices = @transform_3, window_bounds = array<i64: 3, 128>}]} {
    %c0 = arith.constant 0 : index
    %c0_0 = arith.constant 0 : index
    %0 = vector.load %arg3[%c0, %c0_0] : memref<5x128xf32, #tpu.memory_space<vmem>>, vector<5x128xf32>
    %1 = vector.extract_strided_slice %0 {offsets = [0, 0], sizes = [1, 128], strides = [1, 1]} : vector<5x128xf32> to vector<1x128xf32>
    %c0_1 = arith.constant 0 : index
    %c0_2 = arith.constant 0 : index
    %2 = memref.load %arg1[%c0_1, %c0_2] : memref<3x5xf32, #tpu.memory_space<smem>>
    %3 = vector.broadcast %2 : f32 to vector<1x128xf32>
    %4 = arith.mulf %1, %3 : vector<1x128xf32>
    %c0_3 = arith.constant 0 : index
    %5 = memref.load %arg2[%c0_3] : memref<3xf32, #tpu.memory_space<smem>>
    %6 = vector.broadcast %5 : f32 to vector<1x128xf32>
    %7 = arith.addf %4, %6 : vector<1x128xf32>
    %8 = vector.extract_strided_slice %0 {offsets = [1, 0], sizes = [1, 128], strides = [1, 1]} : vector<5x128xf32> to vector<1x128xf32>
    %c0_4 = arith.constant 0 : index
    %c1 = arith.constant 1 : index
    %9 = memref.load %arg1[%c0_4, %c1] : memref<3x5xf32, #tpu.memory_space<smem>>
    %10 = vector.broadcast %9 : f32 to vector<1x128xf32>
    %11 = arith.mulf %8, %10 : vector<1x128xf32>
    %12 = arith.addf %7, %11 : vector<1x128xf32>
    %13 = vector.extract_strided_slice %0 {offsets = [2, 0], sizes = [1, 128], strides = [1, 1]} : vector<5x128xf32> to vector<1x128xf32>
    %c0_5 = arith.constant 0 : index
    %c2 = arith.constant 2 : index
    %14 = memref.load %arg1[%c0_5, %c2] : memref<3x5xf32, #tpu.memory_space<smem>>
    %15 = vector.broadcast %14 : f32 to vector<1x128xf32>
    %16 = arith.mulf %13, %15 : vector<1x128xf32>
    %17 = arith.addf %12, %16 : vector<1x128xf32>
    %18 = vector.extract_strided_slice %0 {offsets = [3, 0], sizes = [1, 128], strides = [1, 1]} : vector<5x128xf32> to vector<1x128xf32>
    %c0_6 = arith.constant 0 : index
    %c3 = arith.constant 3 : index
    %19 = memref.load %arg1[%c0_6, %c3] : memref<3x5xf32, #tpu.memory_space<smem>>
    %20 = vector.broadcast %19 : f32 to vector<1x128xf32>
    %21 = arith.mulf %18, %20 : vector<1x128xf32>
    %22 = arith.addf %17, %21 : vector<1x128xf32>
    %23 = vector.extract_strided_slice %0 {offsets = [4, 0], sizes = [1, 128], strides = [1, 1]} : vector<5x128xf32> to vector<1x128xf32>
    %c0_7 = arith.constant 0 : index
    %c4 = arith.constant 4 : index
    %24 = memref.load %arg1[%c0_7, %c4] : memref<3x5xf32, #tpu.memory_space<smem>>
    %25 = vector.broadcast %24 : f32 to vector<1x128xf32>
    %26 = arith.mulf %23, %25 : vector<1x128xf32>
    %27 = arith.addf %22, %26 : vector<1x128xf32>
    %28 = arith.negf %27 : vector<1x128xf32>
    %29 = math.exp %28 : vector<1x128xf32>
    %cst = arith.constant 1.000000e+00 : f32
    %30 = vector.broadcast %cst : f32 to vector<1x128xf32>
    %31 = arith.addf %30, %29 : vector<1x128xf32>
    %32 = arith.divf %30, %31 : vector<1x128xf32>
    %c0_8 = arith.constant 0 : index
    %c0_9 = arith.constant 0 : index
    %33 = vector.load %arg4[%c0_8, %c0_9] : memref<3x128xf32, #tpu.memory_space<vmem>>, vector<1x128xf32>
    tpu.vector_store %arg4[%c0_8, %c0_9], %32 {strides = array<i32>} : memref<3x128xf32, #tpu.memory_space<vmem>>, vector<1x128xf32>,
    %34 = vector.extract_strided_slice %0 {offsets = [0, 0], sizes = [1, 128], strides = [1, 1]} : vector<5x128xf32> to vector<1x128xf32>
    %c1_10 = arith.constant 1 : index
    %c0_11 = arith.constant 0 : index
    %35 = memref.load %arg1[%c1_10, %c0_11] : memref<3x5xf32, #tpu.memory_space<smem>>
    %36 = vector.broadcast %35 : f32 to vector<1x128xf32>
    %37 = arith.mulf %34, %36 : vector<1x128xf32>
    %c1_12 = arith.constant 1 : index
    %38 = memref.load %arg2[%c1_12] : memref<3xf32, #tpu.memory_space<smem>>
    %39 = vector.broadcast %38 : f32 to vector<1x128xf32>
    %40 = arith.addf %37, %39 : vector<1x128xf32>
    %41 = vector.extract_strided_slice %0 {offsets = [1, 0], sizes = [1, 128], strides = [1, 1]} : vector<5x128xf32> to vector<1x128xf32>
    %c1_13 = arith.constant 1 : index
    %c1_14 = arith.constant 1 : index
    %42 = memref.load %arg1[%c1_13, %c1_14] : memref<3x5xf32, #tpu.memory_space<smem>>
    %43 = vector.broadcast %42 : f32 to vector<1x128xf32>
    %44 = arith.mulf %41, %43 : vector<1x128xf32>
    %45 = arith.addf %40, %44 : vector<1x128xf32>
    %46 = vector.extract_strided_slice %0 {offsets = [2, 0], sizes = [1, 128], strides = [1, 1]} : vector<5x128xf32> to vector<1x128xf32>
    %c1_15 = arith.constant 1 : index
    %c2_16 = arith.constant 2 : index
    %47 = memref.load %arg1[%c1_15, %c2_16] : memref<3x5xf32, #tpu.memory_space<smem>>
    %48 = vector.broadcast %47 : f32 to vector<1x128xf32>
    %49 = arith.mulf %46, %48 : vector<1x128xf32>
    %50 = arith.addf %45, %49 : vector<1x128xf32>
    %51 = vector.extract_strided_slice %0 {offsets = [3, 0], sizes = [1, 128], strides = [1, 1]} : vector<5x128xf32> to vector<1x128xf32>
    %c1_17 = arith.constant 1 : index
    %c3_18 = arith.constant 3 : index
    %52 = memref.load %arg1[%c1_17, %c3_18] : memref<3x5xf32, #tpu.memory_space<smem>>
    %53 = vector.broadcast %52 : f32 to vector<1x128xf32>
    %54 = arith.mulf %51, %53 : vector<1x128xf32>
    %55 = arith.addf %50, %54 : vector<1x128xf32>
    %56 = vector.extract_strided_slice %0 {offsets = [4, 0], sizes = [1, 128], strides = [1, 1]} : vector<5x128xf32> to vector<1x128xf32>
    %c1_19 = arith.constant 1 : index
    %c4_20 = arith.constant 4 : index
    %57 = memref.load %arg1[%c1_19, %c4_20] : memref<3x5xf32, #tpu.memory_space<smem>>
    %58 = vector.broadcast %57 : f32 to vector<1x128xf32>
    %59 = arith.mulf %56, %58 : vector<1x128xf32>
    %60 = arith.addf %55, %59 : vector<1x128xf32>
    %61 = arith.negf %60 : vector<1x128xf32>
    %62 = math.exp %61 : vector<1x128xf32>
    %cst_21 = arith.constant 1.000000e+00 : f32
    %63 = vector.broadcast %cst_21 : f32 to vector<1x128xf32>
    %64 = arith.addf %63, %62 : vector<1x128xf32>
    %65 = arith.divf %63, %64 : vector<1x128xf32>
    %c1_22 = arith.constant 1 : index
    %c0_23 = arith.constant 0 : index
    %66 = vector.load %arg4[%c1_22, %c0_23] : memref<3x128xf32, #tpu.memory_space<vmem>>, vector<1x128xf32>
    tpu.vector_store %arg4[%c1_22, %c0_23], %65 {strides = array<i32>} : memref<3x128xf32, #tpu.memory_space<vmem>>, vector<1x128xf32>,
    %67 = vector.extract_strided_slice %0 {offsets = [0, 0], sizes = [1, 128], strides = [1, 1]} : vector<5x128xf32> to vector<1x128xf32>
    %c2_24 = arith.constant 2 : index
    %c0_25 = arith.constant 0 : index
    %68 = memref.load %arg1[%c2_24, %c0_25] : memref<3x5xf32, #tpu.memory_space<smem>>
    %69 = vector.broadcast %68 : f32 to vector<1x128xf32>
    %70 = arith.mulf %67, %69 : vector<1x128xf32>
    %c2_26 = arith.constant 2 : index
    %71 = memref.load %arg2[%c2_26] : memref<3xf32, #tpu.memory_space<smem>>
    %72 = vector.broadcast %71 : f32 to vector<1x128xf32>
    %73 = arith.addf %70, %72 : vector<1x128xf32>
    %74 = vector.extract_strided_slice %0 {offsets = [1, 0], sizes = [1, 128], strides = [1, 1]} : vector<5x128xf32> to vector<1x128xf32>
    %c2_27 = arith.constant 2 : index
    %c1_28 = arith.constant 1 : index
    %75 = memref.load %arg1[%c2_27, %c1_28] : memref<3x5xf32, #tpu.memory_space<smem>>
    %76 = vector.broadcast %75 : f32 to vector<1x128xf32>
    %77 = arith.mulf %74, %76 : vector<1x128xf32>
    %78 = arith.addf %73, %77 : vector<1x128xf32>
    %79 = vector.extract_strided_slice %0 {offsets = [2, 0], sizes = [1, 128], strides = [1, 1]} : vector<5x128xf32> to vector<1x128xf32>
    %c2_29 = arith.constant 2 : index
    %c2_30 = arith.constant 2 : index
    %80 = memref.load %arg1[%c2_29, %c2_30] : memref<3x5xf32, #tpu.memory_space<smem>>
    %81 = vector.broadcast %80 : f32 to vector<1x128xf32>
    %82 = arith.mulf %79, %81 : vector<1x128xf32>
    %83 = arith.addf %78, %82 : vector<1x128xf32>
    %84 = vector.extract_strided_slice %0 {offsets = [3, 0], sizes = [1, 128], strides = [1, 1]} : vector<5x128xf32> to vector<1x128xf32>
    %c2_31 = arith.constant 2 : index
    %c3_32 = arith.constant 3 : index
    %85 = memref.load %arg1[%c2_31, %c3_32] : memref<3x5xf32, #tpu.memory_space<smem>>
    %86 = vector.broadcast %85 : f32 to vector<1x128xf32>
    %87 = arith.mulf %84, %86 : vector<1x128xf32>
    %88 = arith.addf %83, %87 : vector<1x128xf32>
    %89 = vector.extract_strided_slice %0 {offsets = [4, 0], sizes = [1, 128], strides = [1, 1]} : vector<5x128xf32> to vector<1x128xf32>
    %c2_33 = arith.constant 2 : index
    %c4_34 = arith.constant 4 : index
    %90 = memref.load %arg1[%c2_33, %c4_34] : memref<3x5xf32, #tpu.memory_space<smem>>
    %91 = vector.broadcast %90 : f32 to vector<1x128xf32>
    %92 = arith.mulf %89, %91 : vector<1x128xf32>
    %93 = arith.addf %88, %92 : vector<1x128xf32>
    %94 = arith.negf %93 : vector<1x128xf32>
    %95 = math.exp %94 : vector<1x128xf32>
    %cst_35 = arith.constant 1.000000e+00 : f32
    %96 = vector.broadcast %cst_35 : f32 to vector<1x128xf32>
    %97 = arith.addf %96, %95 : vector<1x128xf32>
    %98 = arith.divf %96, %97 : vector<1x128xf32>
    %c2_36 = arith.constant 2 : index
    %c0_37 = arith.constant 0 : index
    %99 = vector.load %arg4[%c2_36, %c0_37] : memref<3x128xf32, #tpu.memory_space<vmem>>, vector<1x128xf32>
    tpu.vector_store %arg4[%c2_36, %c0_37], %98 {strides = array<i32>} : memref<3x128xf32, #tpu.memory_space<vmem>>, vector<1x128xf32>,
    return
  }
  func.func @transform_0(%arg0: i32) -> (i32, i32) {
    %c0_i32 = arith.constant 0 : i32
    %c0_i32_0 = arith.constant 0 : i32
    %c0_i32_1 = arith.constant 0 : i32
    return %c0_i32, %c0_i32_0 : i32, i32
  }
  func.func @transform_1(%arg0: i32) -> i32 {
    %c0_i32 = arith.constant 0 : i32
    %c0_i32_0 = arith.constant 0 : i32
    return %c0_i32 : i32
  }
  func.func @transform_2(%arg0: i32) -> (i32, i32) {
    %c0_i32 = arith.constant 0 : i32
    %c0_i32_0 = arith.constant 0 : i32
    return %c0_i32, %arg0 : i32, i32
  }
  func.func @transform_3(%arg0: i32) -> (i32, i32) {
    %c0_i32 = arith.constant 0 : i32
    %c0_i32_0 = arith.constant 0 : i32
    return %c0_i32, %arg0 : i32, i32
  }
}

</mosaic_0001>

<bundles_post_ra>
// kernel: tpu_custom_call.1
= control target key start
LH: loop header
LB: loop body
LE: loop exit
PB: predicated region body
PF: predicated region fallthrough
CT: control target
= control target key end

     0   :  { %8 = vsyncpa [#allocation5], 0  ;;  %s921_s0 = inlined_call_operand.hbm [shape: f32[3,5], index: 0, kind: input, shape index: {}]   ;;  %s922_s1 = inlined_call_operand.hbm [shape: f32[3], index: 1, kind: input, shape index: {}]   ;;  %s923_s2 = inlined_call_operand.hbm [shape: f32[5,256], index: 2, kind: input, shape index: {}]   ;;  %s924_s3 = inlined_call_operand.hbm [shape: f32[3,256], index: 3, kind: output, shape index: {}]  }
   0x1   :  { %9 = vsyncpa [#allocation7], 0 }
   0x2   :  { %10 = vsyncpa [#allocation3], 0 }
   0x3   :  { %12 = vsyncpa [#allocation3 + $0x1], 0 }
   0x4   :  { %13 = vsyncpa [#allocation4], 0 }
   0x5   :  { %15 = vsyncpa [#allocation4 + $0x1], 0  ;;  %s758_s12 = smov 0   ;;  %s760_s13 = smov 0  }
   0x6   :  { %s762_s14 = smov 0   ;;  %s764_s15 = smov 0  }
   0x7 LB: > { %s779_s16 = sadd.s32 4294967295, %s734_s15   ;;  %s486_s17 = sadd.s32 4294967294, %s734_s15   ;;  %s734_s15 = sphi %s764_s15, %s934_s15   ;;  %s730_s14 = sphi %s762_s14, %s933_s14   ;;  %s726_s13 = sphi %s760_s13, %s932_s13   ;;  %s722_s12 = sphi %s758_s12, %s931_s12  }
   0x8   : > { %p83_p0 = scmp.ne.s32.totalorder %s726_s13, %s722_s12  ;;  %p84_p1 = scmp.eq.s32.totalorder %s779_s16, 0 }
   0x9   : > { %p107_p2 = scmp.eq.s32.totalorder %s779_s16, 1  ;;  %p113_p3 = scmp.eq.s32.totalorder %s486_s17, 1 }
   0xa   : > { %p788_p4 = por %p84_p1, %p83_p0  ;;  %p487_p5 = scmp.ge.s32.totalorder %s734_s15, 1 }
   0xb   : > { %p793_p6 = por %p113_p3, %p83_p0  ;;  %p120_p7 = scmp.lt.s32.totalorder %s734_s15, 3 }
   0xc   : > { %s132_s22 = sshll.u32 %s921_s0, 4  ;;  %s142_s26 = sshll.u32 %s922_s1, 4  ;;  %s133_s22 = int_to_ptr.hbm [resolvable:$true] %s132_s22  ;;  %s143_s26 = int_to_ptr.hbm [resolvable:$true] %s142_s26 }
   0xd   : > { %p801_p8 = pnand %p487_p5, %p120_p7  ;;  %s814_s27 = sadd.s32 1, %s734_s15  }
   0xe   : > { %s67_s28 = ssub.s32 %s734_s15, %s814_s27  ;;  %s736_s29 = smov [#allocation2]  }
   0xf   : > { %p533_p10 = pneg %p801_p8  ;;  %s737_s30 = smov [#allocation6]  }
  0x10   : > { %p68_p12 = scmp.eq.s32.totalorder %s67_s28, 0  ;;  %s70_s4 = sadd.s32 1, %s730_s14 }
  0x11   : > { %p534_p11 = pnand %p533_p10, %p84_p1  ;;  %p77_p13 = scmp.ne.s32.totalorder %s730_s14, %s726_s13 }
  0x12   : > { %p78_p0 = scmp.eq.s32.totalorder %s734_s15, 0  ;;  %p550_p7 = scmp.lt.s32.totalorder %s734_s15, 2 }
  0x13   : > { %536 = dma.hbm_to_smem (!%p534_p11), %s133_s22, 64, %s736_s29, [#allocation5]  }
  0x14   : > { %539 = dma.hbm_to_smem (!%p534_p11), %s143_s26, 16, %s737_s30, [#allocation7]  }
  0x15   : > { %s823_s5 = scalar_select %p68_p12, %s730_s14, %s70_s4  }
  0x16   : > { %p79_p3 = por %p78_p0, %p77_p13  ;;  %p827_p5 = por %p107_p2, %p77_p13 }
  0x17   : > { %s153_s7 = sand.u32 1, %s730_s14   ;;  %s492_s9 = sshll.u32 %s734_s15, 3 }
  0x18   : > { %s491_s8 = sshll.u32 %s153_s7, 3  ;;  %s161_s17 = scalar_lea.hbm %s923_s2, %s492_s9 }
  0x19   : > { %s157_s20 = scalar_lea.vmem [#allocation8], %s491_s8  ;;  %s163_s22 = sshll.u32 %s161_s17, 4  ;;  %s164_s22 = int_to_ptr.hbm [resolvable:$true] %s163_s22 }
  0x1a   : > { %s165_s21 = sshll.u32 %s157_s20, 4  ;;  %p837_p10 = pnand %p550_p7, %p79_p3  ;;  %s166_s21 = int_to_ptr.vmem [resolvable:$true] %s165_s21 }
  0x1b   : > { %s154_s25 = scalar_lea.sflag [#allocation3], %s153_s7  ;;  %s630_s26 = sshra.s32 %s164_s22, 4  ;;  %s631_s26 = int_to_ptr.hbm [resolvable:$true] %s630_s26 }
  0x1c   : > { %s632_s28 = scalar_lea.hbm %s631_s26, 8  ;;  %p634_p11 = pneg %p837_p10 }
  0x1d   : > { %p633_p2 = scmp.ne.s32.totalorder %s631_s26, %s632_s28  ;;  %s637_s4 = scalar_lea.hbm %s923_s2, 16 }
  0x1e   : > { %p638_p0 = scmp.lt.s32.totalorder %s631_s26, %s923_s2  ;;  %p639_p3 = scmp.lt.s32.totalorder %s637_s4, %s632_s28 }
  0x1f   : > { %p635_p12 = pnand %p634_p11, %p633_p2 }
  0x20   : > { %p640_p7 = por %p639_p3, %p638_p0 }
  0x21   : > { %p636_p13 = pneg %p635_p12 }
  0x23   : > { %p641_p9 = pnand %p640_p7, %p636_p13 }
  0x25   : > { %644 = shalt.err (!%p641_p9)
}
  0x26   : > { %543 = dma.hbm_to_vmem [thread:$0]  (!%p837_p10), %s164_s22, 128, %s166_s21, %s154_s25  }
  0x27   : > { %174 = sbr.rel (%p801_p8) target bundleno = 117 (0x75), region = 32 }
  0x2c   : > { %705 = dma.done.wait (%p84_p1), [#allocation5], 64  }
  0x2d   : > { %707 = vsyncadd (%p84_p1), [#allocation5], 4294967232 }
  0x2e   : > { %709 = dma.done.wait (%p84_p1), [#allocation7], 16  }
  0x2f   : > { %711 = vsyncadd (%p84_p1), [#allocation7], 4294967280  ;;  %s862_s7 = sand.u32 1, %s726_s13  }
  0x30   : > { %s496_s23 = sshll.u32 %s862_s7, 3  ;;  %s187_s10 = scalar_lea.sflag [#allocation3], %s862_s7 }
  0x31   : > { %s190_s11 = scalar_lea.vmem [#allocation8], %s496_s23 }
  0x32   : > { %713 = dma.done.wait (%p788_p4), %s187_s10, 128  }
  0x33   : > { %715 = vsyncadd (%p788_p4), %s187_s10, 4294967168 }
  0x34   : > { %196 = sfence }
  0x35   : > { %s216_s17 = sld [smem:[#allocation2]]  ;;  %v870_v0 = vld [vmem:[%s190_s11] sm:$0x1f] }
  0x36   : > { %s219_s20 = sld [smem:[#allocation6]] }
  0x37   : > { %s498_s21 = sld [smem:[#allocation2 + $0x1]] }
  0x38   : > { %s499_s22 = sld [smem:[#allocation2 + $0x2]] }
  0x39   : > { %s500_s24 = sld [smem:[#allocation2 + $0x3]] }
  0x3a   : > { %s501_s25 = sld [smem:[#allocation2 + $0x4]] }
  0x3b   : > { %v217_v1 = vstv %s216_s17  ;;  %s503_s26 = sld [smem:[#allocation2 + $0x80]] }
  0x3c   : > { %v218_v2 = vmul.f32 %v217_v1, %v870_v0  ;;  %v220_v3 = vstv %s219_s20  ;;  %s504_s28 = sld [smem:[#allocation6 + $0x1]]  ;;  %s497_s20 = sshll.u32 %s862_s7, 2 }
  0x3d   : > { %v223_v4 = vstv %s498_s21  ;;  %s505_s29 = sld [smem:[#allocation2 + $0x81]]  ;;  %s214_s21 = scalar_lea.vmem [#allocation9], %s497_s20 }
  0x3e   : > { %v221_v5 = vadd.f32 %v220_v3, %v218_v2  ;;  %v224_v6 = vmul.f32 %v223_v4, %v870_v0  ;;  %v230_v7 = vstv %s499_s22  ;;  %s506_s18 = sld [smem:[#allocation2 + $0x82]]  ;;  %s518_s22 = sshll.u32 %s779_s16, 2 }
  0x3f   : > { %v231_v8 = vmul.f32 %v230_v7, %v870_v0  ;;  %v237_v9 = vstv %s500_s24  ;;  %s507_s30 = sld [smem:[#allocation2 + $0x83]] }
  0x40   : > { %v226_v10 = vrot.slane %v224_v6, 1  ;;  %v238_v11 = vmul.f32 %v237_v9, %v870_v0  ;;  %v244_v12 = vstv %s501_s25  ;;  %s508_s4 = sld [smem:[#allocation2 + $0x84]] }
  0x41   : > { %v233_v13 = vrot.slane %v231_v8, 2  ;;  %v245_v14 = vmul.f32 %v244_v12, %v870_v0  ;;  %v271_v15 = vstv %s503_s26  ;;  %s510_s8 = sld [smem:[#allocation2 + $0x100]]  ;;  %s389_s26 = scalar_lea.hbm %s924_s3, %s518_s22 }
  0x42   : > { %v228_v16 = vadd.f32 %v226_v10, %v221_v5  ;;  %v240_v17 = vrot.slane %v238_v11, 3  ;;  %v272_v18 = vmul.f32 %v271_v15, %v870_v0  ;;  %v274_v19 = vstv %s504_s28  ;;  %s511_s9 = sld [smem:[#allocation6 + $0x2]]  ;;  %s391_s28 = sshll.u32 %s214_s21, 4  ;;  %s392_s28 = int_to_ptr.vmem [resolvable:$true] %s391_s28 }
  0x43   : > { %v247_v20 = vrot.slane %v245_v14, 4  ;;  %v277_v21 = vstv %s505_s29  ;;  %s512_s23 = sld [smem:[#allocation2 + $0x101]]  ;;  %s393_s16 = sshll.u32 %s389_s26, 4  ;;  %s394_s16 = int_to_ptr.hbm [resolvable:$true] %s393_s16 }
  0x44   : > { %v235_v22 = vadd.f32 %v233_v13, %v228_v16  ;;  %v275_v23 = vadd.f32 %v274_v19, %v272_v18  ;;  %v278_v24 = vmul.f32 %v277_v21, %v870_v0  ;;  %v284_v25 = vstv %s506_s18  ;;  %s513_s10 = sld [smem:[#allocation2 + $0x102]]  ;;  %s379_s29 = scalar_lea.sflag [#allocation4], %s862_s7 }
  0x45   : > { %v285_v26 = vmul.f32 %v284_v25, %v870_v0  ;;  %v291_v27 = vstv %s507_s30  ;;  %s514_s11 = sld [smem:[#allocation2 + $0x103]]  ;;  %s674_s18 = sshra.s32 %s394_s16, 4  ;;  %s675_s18 = int_to_ptr.hbm [resolvable:$true] %s674_s18 }
  0x46   : > { %v242_v28 = vadd.f32 %v240_v17, %v235_v22  ;;  %v280_v29 = vrot.slane %v278_v24, 1  ;;  %v292_v30 = vmul.f32 %v291_v27, %v870_v0  ;;  %v298_v31 = vstv %s508_s4  ;;  %s515_s17 = sld [smem:[#allocation2 + $0x104]]  ;;  %s676_s30 = scalar_lea.hbm %s675_s18, 4 }
  0x47   : > { %v287_v32 = vrot.slane %v285_v26, 2  ;;  %v299_v33 = vmul.f32 %v298_v31, %v870_v0  ;;  %v325_v34 = vstv %s510_s8  ;;  %p677_p1 = scmp.ne.s32.totalorder %s675_s18, %s676_s30  ;;  %p681_p9 = scmp.lt.s32.totalorder %s675_s18, %s924_s3 }
  0x48   : > { %v249_v35 = vadd.f32 %v247_v20, %v242_v28  ;;  %v282_v36 = vadd.f32 %v280_v29, %v275_v23  ;;  %v294_v37 = vrot.slane %v292_v30, 3  ;;  %v326_v38 = vmul.f32 %v325_v34, %v870_v0 }
  0x49   : > { %v301_v39 = vrot.slane %v299_v33, 4  ;;  %v328_v40 = vstv %s511_s9  ;;  %v331_v41 = vstv %s512_s23  ;;  %p678_p4 = pnand %p677_p1, %p827_p5  ;;  %s680_s9 = scalar_lea.hbm %s924_s3, 8 }
  0x4a   : > { %v502_v42 = vmul.f32 -1.442695, %v249_v35  ;;  %v289_v43 = vadd.f32 %v287_v32, %v282_v36  ;;  %v329_v44 = vadd.f32 %v328_v40, %v326_v38  ;;  %v332_v45 = vmul.f32 %v331_v41, %v870_v0  ;;  %p682_p10 = scmp.lt.s32.totalorder %s680_s9, %s676_s30 }
  0x4b   : > { %v338_v46 = vstv %s513_s10  ;;  %v345_v47 = vstv %s514_s11  ;;  %p679_p8 = pneg %p678_p4 }
  0x4c   : > { %588 = vpow2.f32 %v502_v42  ;;  %v296_v48 = vadd.f32 %v294_v37, %v289_v43  ;;  %v334_v49 = vrot.slane %v332_v45, 1  ;;  %v339_v50 = vmul.f32 %v338_v46, %v870_v0  ;;  %p683_p2 = por %p682_p10, %p681_p9 }
  0x4d   : > { %v346_v51 = vmul.f32 %v345_v47, %v870_v0  ;;  %v352_v52 = vstv %s515_s17 }
  0x4e   : > { %v303_v53 = vadd.f32 %v301_v39, %v296_v48  ;;  %v336_v54 = vadd.f32 %v334_v49, %v329_v44  ;;  %v341_v55 = vrot.slane %v339_v50, 2  ;;  %v353_v56 = vmul.f32 %v352_v52, %v870_v0  ;;  %p684_p11 = pnand %p683_p2, %p679_p8 }
  0x4f   : > { %v348_v57 = vrot.slane %v346_v51, 3 }
  0x50   : > { %v509_v58 = vmul.f32 -1.442695, %v303_v53  ;;  %v343_v59 = vadd.f32 %v341_v55, %v336_v54  ;;  %v355_v60 = vrot.slane %v353_v56, 4 }
  0x52   : > { %v589_v61 = vpop.eup %588  ;;  %590 = vpow2.f32 %v509_v58  ;;  %v350_v62 = vadd.f32 %v348_v57, %v343_v59 }
  0x53   : > { %v253_v63 = vadd.f32 1.0, %v589_v61 }
  0x54   : > { %v357_v1 = vadd.f32 %v355_v60, %v350_v62 }
  0x55   : > { %592 = vrcp.f32 %v253_v63  ;;  %v265_v7 = vand.u32 2147483648, %v253_v63  ;;  %vm259_vm0 = vweird.f32 %v253_v63  ;;  %v263_v9 = vand.u32 2147483647, %v253_v63 }
  0x56   : > { %v516_v2 = vmul.f32 -1.442695, %v357_v1 }
  0x57   : > { %v266_v13 = vor.u32 1.1754944e-38, %v265_v7  ;;  %vm264_vm3 = vcmp.eq.f32.partialorder %v263_v9, 8.507059e+37 }
  0x58   : > { %v591_v3 = vpop.eup %590  ;;  %594 = vpow2.f32 %v516_v2 }
  0x59   : > { %v307_v4 = vadd.f32 1.0, %v591_v3 }
  0x5b   : > { %v593_v5 = vpop.eup %592  ;;  %596 = vrcp.f32 %v307_v4  ;;  %vm313_vm4 = vweird.f32 %v307_v4  ;;  %v319_v16 = vand.u32 2147483648, %v307_v4  ;;  %v317_v19 = vand.u32 2147483647, %v307_v4 }
  0x5c   : > { %v255_v6 = vmul.f32 %v593_v5, %v253_v63  ;;  %vm260_vm1 = vweird.f32 %v593_v5 }
  0x5d   : > { %vm261_vm2 = vmor %vm259_vm0, %vm260_vm1  ;;  %v320_v23 = vor.u32 1.1754944e-38, %v319_v16  ;;  %vm318_vm7 = vcmp.eq.f32.partialorder %v317_v19, 8.507059e+37 }
  0x5e   : > { %v595_v0 = vpop.eup %594  ;;  %v256_v8 = vsub.f32 1.0, %v255_v6 }
  0x5f   : > { %v361_v10 = vadd.f32 1.0, %v595_v0 }
  0x60   : > { %v257_v11 = vmul.f32 %v593_v5, %v256_v8 }
  0x61   : > { %v597_v12 = vpop.eup %596  ;;  %598 = vrcp.f32 %v361_v10  ;;  %vm367_vm8 = vweird.f32 %v361_v10  ;;  %v373_v26 = vand.u32 2147483648, %v361_v10  ;;  %v371_v29 = vand.u32 2147483647, %v361_v10 }
  0x62   : > { %v258_v14 = vadd.f32 %v593_v5, %v257_v11  ;;  %v309_v15 = vmul.f32 %v597_v12, %v307_v4  ;;  %vm314_vm5 = vweird.f32 %v597_v12 }
  0x63   : > { %vm315_vm6 = vmor %vm313_vm4, %vm314_vm5  ;;  %v374_v32 = vor.u32 1.1754944e-38, %v373_v26  ;;  %vm372_vm11 = vcmp.eq.f32.partialorder %v371_v29, 8.507059e+37 }
  0x64   : > { %v262_v17 = vsel %vm261_vm2, %v593_v5, %v258_v14  ;;  %v310_v18 = vsub.f32 1.0, %v309_v15 }
  0x65   : > { %v267_v20 = vsel %vm264_vm3, %v266_v13, %v262_v17 }
  0x66   : > { %269 = vst [vmem:[%s214_s21] sm:$0x1] %v267_v20  ;;  %v311_v21 = vmul.f32 %v597_v12, %v310_v18 }
  0x67   : > { %v599_v22 = vpop.eup %598 }
  0x68   : > { %v312_v24 = vadd.f32 %v597_v12, %v311_v21  ;;  %v363_v25 = vmul.f32 %v599_v22, %v361_v10  ;;  %vm368_vm9 = vweird.f32 %v599_v22 }
  0x69   : > { %vm369_vm10 = vmor %vm367_vm8, %vm368_vm9 }
  0x6a   : > { %v316_v27 = vsel %vm315_vm6, %v597_v12, %v312_v24  ;;  %v364_v28 = vsub.f32 1.0, %v363_v25 }
  0x6b   : > { %v321_v30 = vsel %vm318_vm7, %v320_v23, %v316_v27 }
  0x6c   : > { %323 = vst [vmem:[%s214_s21 + $0x1] sm:$0x1] %v321_v30  ;;  %v365_v31 = vmul.f32 %v599_v22, %v364_v28 }
  0x6e   : > { %v366_v33 = vadd.f32 %v599_v22, %v365_v31 }
  0x70   : > { %v370_v34 = vsel %vm369_vm10, %v599_v22, %v366_v33 }
  0x71   : > { %v375_v35 = vsel %vm372_vm11, %v374_v32, %v370_v34 }
  0x72   : > { %377 = vst [vmem:[%s214_s21 + $0x2] sm:$0x1] %v375_v35 }
  0x73   : > { %687 = shalt.err (!%p684_p11)
}
  0x74   : > { %531 = dma.vmem_to_hbm [thread:$0]  (%p827_p5), %s392_s28, 64, %s394_s16, %s379_s29  }
  0x75 PF: > { %s405_s7 = sand.u32 1, %s722_s12   ;;  %p930_p12 = scmp.ge.s32.totalorder %s734_s15, 2 }
  0x76   : > { %s406_s11 = scalar_lea.sflag [#allocation4], %s405_s7 }
  0x77   : > { %p545_p13 = pnand %p930_p12, %p793_p6 }
  0x79   : > { %p546_p0 = pneg %p545_p13 }
  0x7b   : > { %717 = dma.done.wait (%p546_p0), %s406_s11, 64  }
  0x7c   : > { %719 = vsyncadd (%p546_p0), %s406_s11, 4294967232  ;;  %p18_p3 = scmp.ge.s32.totalorder %s814_s27, 4   ;;  %s931_s12 = smov %s726_s13 }
  0x7d   : > { %s932_s13 = smov %s730_s14  ;;  %s933_s14 = smov %s823_s5 }
  0x7e   : > { %s934_s15 = smov %s814_s27  ;;  %20 = sbr.rel (!%p18_p3) target bundleno = 7 (0x7), region = 86 }
  0x83   :  { %412 = vsyncpa [#allocation3], 1 }
  0x84   :  { %414 = vsyncpa [#allocation3 + $0x1], 1 }
  0x85   :  { %415 = vsyncpa [#allocation4], 1 }
  0x86   :  { %417 = vsyncpa [#allocation4 + $0x1], 1 }
  0x87   :  { %418 = vsyncpa [#allocation5], 1 }
  0x88   :  { %420 = vsyncpa [#allocation5 + $0x1], 1 }
  0x89   :  { %421 = vsyncpa [#allocation7], 1 }

</bundles_post_ra>
